<compile_context>
chip_gen: v6e
topology: v6e:2x2x1
jax: 0.10.0
libtpu: 0.0.40
codegen_flags: <defaults>
</compile_context>

<pallas_src>
import functools
import math
import numpy as np
import jax
import jax.numpy as jnp
from jax.experimental import pallas as pl
from jax.experimental.pallas import tpu as pltpu

LEAKY_SLOPE = 0.01   # InPlaceABNSync default leaky_relu slope
BN_EPS = 1e-5
# Above every chip's default scoped VMEM (16/32/32 MiB) and below every chip's
# physical VMEM (128/128/64 MiB).  Tune per generation for production shapes.
VMEM_LIMIT_BYTES = 48 * 1024 * 1024


# --------------------------------------------------------------------------
# Pallas kernels
# --------------------------------------------------------------------------
def _fused_stage_kernel(x_ref, p_ref, w_ref, s_ref, b_ref, m_ref, up_ref, o_ref):
    # x_ref:  (1, HW, Cin)            flattened-spatial input (channels-last)
    # p_ref:  (S, HW)                 vertically stacked adaptive-pool matrices
    # w_ref:  (Cin, nS*Cout)          per-stage 1x1 conv weights, stacked on cols
    # s_ref / b_ref: (1, nS*Cout)     folded BN scale / bias per stage block
    # m_ref:  (S, nS*Cout)            block-diagonal selector (stage rows <-> cols)
    # up_ref: (HW, S)                 horizontally stacked bilinear matrices
    # o_ref:  (1, HW, nS*Cout + Cin)  concatenated priors (+ identity feats)
    x = x_ref[0]                                                             # (HW, Cin)
    pooled = jnp.dot(p_ref[...], x, preferred_element_type=jnp.float32)      # (S, Cin)
    conv = jnp.dot(pooled, w_ref[...], preferred_element_type=jnp.float32)   # (S, nS*Cout)
    y = conv * s_ref[...] + b_ref[...]                                       # folded BN
    y = jnp.where(y >= 0, y, LEAKY_SLOPE * y)                                # leaky relu
    y = y * m_ref[...]                                                       # block-diag
    # One fused K=S upsample matmul produces all stage outputs at once.
    up = jnp.dot(up_ref[...], y, preferred_element_type=jnp.float32)         # (HW, nS*Cout)
    o_ref[0] = jnp.concatenate([up, x], axis=-1).astype(o_ref.dtype)


def _bottleneck_kernel(x_ref, w_ref, s_ref, b_ref, o_ref, acc_ref):
    # x_ref: (1, HW, Ct)    w_ref: (9, Ct, Cout)    s_ref/b_ref: (1, Cout)
    # o_ref: (1, H, W, Cout)
    # acc_ref: VMEM scratch (H+2, W+2, Cout) f32 — padded accumulator; writes
    #          that land in the 1-wide halo are discarded == zero padding.
    _, H, W, Co = o_ref.shape
    x = x_ref[0]                                                             # (HW, Ct)
    acc_ref[...] = jnp.zeros_like(acc_ref)
    for dy in range(3):
        for dx in range(3):
            # Unshifted 2-D matmul per tap (no shifted slices of the wide-Ct
            # tensor); the spatial shift is applied to the narrow Cout result.
            tap = jnp.dot(x, w_ref[dy * 3 + dx],
                          preferred_element_type=jnp.float32)                # (HW, Co)
            tap = tap.reshape(H, W, Co)
            # out[h, w] += x[h+dy-1, w+dx-1] * W[dy, dx]
            #   -> tap[h', w'] contributes to padded-acc[h'+2-dy, w'+2-dx]
            acc_ref[pl.ds(2 - dy, H), pl.ds(2 - dx, W), :] += tap
    y = acc_ref[pl.ds(1, H), pl.ds(1, W), :]                                 # conv result
    y = y * s_ref[0] + b_ref[0]                                              # folded BN
    y = jnp.where(y >= 0, y, LEAKY_SLOPE * y)                                # leaky relu
    o_ref[0] = y.astype(o_ref.dtype)


# --------------------------------------------------------------------------
# pallas_call wrappers
# --------------------------------------------------------------------------
def run_fused_stages(x_flat, p_all, w_cat, scale_cat, bias_cat, mask, b_all):
    N, HW, Cin = x_flat.shape
    S = p_all.shape[0]
    nCo = w_cat.shape[1]
    Ctot = nCo + Cin
    flops = 2 * N * (S * HW * Cin + S * Cin * nCo + HW * S * nCo)
    bytes_accessed = 4 * (N * HW * Cin + S * HW + Cin * nCo + 2 * nCo
                          + S * nCo + HW * S + N * HW * Ctot)
    return pl.pallas_call(
        _fused_stage_kernel,
        out_shape=jax.ShapeDtypeStruct((N, HW, Ctot), jnp.float32),
        grid=(N,),
        in_specs=[
            pl.BlockSpec((1, HW, Cin), lambda n: (n, 0, 0)),
            pl.BlockSpec((S, HW), lambda n: (0, 0)),
            pl.BlockSpec((Cin, nCo), lambda n: (0, 0)),
            pl.BlockSpec((1, nCo), lambda n: (0, 0)),
            pl.BlockSpec((1, nCo), lambda n: (0, 0)),
            pl.BlockSpec((S, nCo), lambda n: (0, 0)),
            pl.BlockSpec((HW, S), lambda n: (0, 0)),
        ],
        out_specs=pl.BlockSpec((1, HW, Ctot), lambda n: (n, 0, 0)),
        compiler_params=pltpu.CompilerParams(
            dimension_semantics=("parallel",),
            vmem_limit_bytes=VMEM_LIMIT_BYTES),
        cost_estimate=pl.CostEstimate(flops=flops, transcendentals=0,
                                      bytes_accessed=bytes_accessed),
    )(x_flat, p_all, w_cat, scale_cat, bias_cat, mask, b_all)


def run_bottleneck(cat_flat, H, W, wb9, scale, bias):
    N, HW, Ct = cat_flat.shape
    Co = wb9.shape[-1]
    flops = 2 * N * 9 * HW * Ct * Co
    bytes_accessed = 4 * (N * HW * Ct + 9 * Ct * Co + 2 * Co + N * HW * Co)
    # NOTE: for production PSP sizes (H,W~97, Ct~4096) add a row-tiling grid
    # axis with a halo plus a Ct-reduction axis and bf16 inputs; at these toy
    # shapes a whole image + weights fit comfortably in VMEM.
    return pl.pallas_call(
        _bottleneck_kernel,
        out_shape=jax.ShapeDtypeStruct((N, H, W, Co), jnp.float32),
        grid=(N,),
        in_specs=[
            pl.BlockSpec((1, HW, Ct), lambda n: (n, 0, 0)),
            pl.BlockSpec((9, Ct, Co), lambda n: (0, 0, 0)),
            pl.BlockSpec((1, Co), lambda n: (0, 0)),
            pl.BlockSpec((1, Co), lambda n: (0, 0)),
        ],
        out_specs=pl.BlockSpec((1, H, W, Co), lambda n: (n, 0, 0, 0)),
        scratch_shapes=[pltpu.VMEM((H + 2, W + 2, Co), jnp.float32)],
        compiler_params=pltpu.CompilerParams(
            dimension_semantics=("parallel",),
            vmem_limit_bytes=VMEM_LIMIT_BYTES),
        cost_estimate=pl.CostEstimate(flops=flops, transcendentals=0,
                                      bytes_accessed=bytes_accessed),
    )(cat_flat, wb9, scale, bias)


# --------------------------------------------------------------------------
# Host-side glue: static pooling / interpolation matrices, params, forward
# --------------------------------------------------------------------------
def adaptive_pool_matrix(H, W, s):
    """P @ x_flat reproduces nn.AdaptiveAvgPool2d((s, s))."""
    P = np.zeros((s * s, H * W), np.float32)
    for i in range(s):
        r0, r1 = (i * H) // s, -((-(i + 1) * H) // s)
        for j in range(s):
            c0, c1 = (j * W) // s, -((-(j + 1) * W) // s)
            val = 1.0 / ((r1 - r0) * (c1 - c0))
            for rr in range(r0, r1):
                for cc in range(c0, c1):
                    P[i * s + j, rr * W + cc] = val
    return P


def bilinear_up_matrix(H, W, s):
    """B @ pooled_flat reproduces F.interpolate(..., 'bilinear', align_corners=True)."""
    def axis_w(out_len, in_len):
        M = np.zeros((out_len, in_len), np.float32)
        for o in range(out_len):
            if in_len == 1:
                M[o, 0] = 1.0
                continue
            src = o * (in_len - 1) / (out_len - 1)
            i0 = min(int(math.floor(src)), in_len - 1)
            i1 = min(i0 + 1, in_len - 1)
            f = src - i0
            M[o, i0] += 1.0 - f
            M[o, i1] += f
        return M
    Wy, Wx = axis_w(H, s), axis_w(W, s)
    return np.einsum('yi,xj->yxij', Wy, Wx).reshape(H * W, s * s).astype(np.float32)


@functools.lru_cache(maxsize=None)
def fused_stage_constants(H, W, sizes, cout):
    """Stacked pool matrix (S,HW), stacked bilinear matrix (HW,S), block mask."""
    s_tot = sum(s * s for s in sizes)
    P = np.zeros((s_tot, H * W), np.float32)
    B = np.zeros((H * W, s_tot), np.float32)
    M = np.zeros((s_tot, len(sizes) * cout), np.float32)
    off = 0
    for si, s in enumerate(sizes):
        P[off:off + s * s, :] = adaptive_pool_matrix(H, W, s)
        B[:, off:off + s * s] = bilinear_up_matrix(H, W, s)
        M[off:off + s * s, si * cout:(si + 1) * cout] = 1.0
        off += s * s
    return jnp.asarray(P), jnp.asarray(B), jnp.asarray(M)


def _folded_bn(c):
    gamma = jnp.linspace(0.5, 1.5, c, dtype=jnp.float32)
    beta = jnp.linspace(-0.2, 0.2, c, dtype=jnp.float32)
    mean = jnp.zeros((c,), jnp.float32)
    var = jnp.ones((c,), jnp.float32)
    scale = gamma / jnp.sqrt(var + BN_EPS)
    bias = beta - mean * scale
    return scale.reshape(1, -1), bias.reshape(1, -1)


def init_params(key, features, out_features, sizes):
    keys = jax.random.split(key, len(sizes) + 1)
    stages = []
    for si, _ in enumerate(sizes):
        w = 0.1 * jax.random.normal(keys[si], (features, out_features), jnp.float32)
        scale, bias = _folded_bn(out_features)
        stages.append(dict(w=w, scale=scale, bias=bias))
    ct = features + len(sizes) * out_features
    wb = 0.05 * jax.random.normal(keys[-1], (3, 3, ct, out_features), jnp.float32)
    b_scale, b_bias = _folded_bn(out_features)
    return dict(stages=stages, wb=wb, b_scale=b_scale, b_bias=b_bias)


def psp_forward(feats_nchw, params, sizes):
    N, Cin, H, W = feats_nchw.shape
    Cout = params['stages'][0]['w'].shape[1]
    x_nhwc = jnp.transpose(feats_nchw, (0, 2, 3, 1))
    x_flat = x_nhwc.reshape(N, H * W, Cin)

    p_all, b_all, mask = fused_stage_constants(H, W, tuple(sizes), Cout)
    w_cat = jnp.concatenate([sp['w'] for sp in params['stages']], axis=1)
    scale_cat = jnp.concatenate([sp['scale'] for sp in params['stages']], axis=1)
    bias_cat = jnp.concatenate([sp['bias'] for sp in params['stages']], axis=1)

    # Fused: 4 pyramid stages + torch.cat(priors, 1), one HBM pass of x.
    cat_flat = run_fused_stages(x_flat, p_all, w_cat, scale_cat, bias_cat, mask, b_all)

    ct = cat_flat.shape[-1]
    wb9 = params['wb'].reshape(9, ct, Cout)          # (3,3,Ct,Co) -> (9,Ct,Co)
    out_nhwc = run_bottleneck(cat_flat, H, W, wb9, params['b_scale'], params['b_bias'])
    return jnp.transpose(out_nhwc, (0, 3, 1, 2))     # back to NCHW


def psp_reference(feats_nchw, params, sizes):
    """Plain-JAX reference for correctness check."""
    N, Cin, H, W = feats_nchw.shape
    x_nhwc = jnp.transpose(feats_nchw, (0, 2, 3, 1))
    x_flat = x_nhwc.reshape(N, H * W, Cin)
    priors = []
    for s, sp in zip(sizes, params['stages']):
        P = jnp.asarray(adaptive_pool_matrix(H, W, s))
        B = jnp.asarray(bilinear_up_matrix(H, W, s))
        pooled = jnp.einsum('ph,nhc->npc', P, x_flat)
        conv = jnp.einsum('npc,cd->npd', pooled, sp['w'])
        y = conv * sp['scale'] + sp['bias']
        y = jnp.where(y >= 0, y, LEAKY_SLOPE * y)
        up = jnp.einsum('hp,npd->nhd', B, y)
        priors.append(up.reshape(N, H, W, -1))
    priors.append(x_nhwc)
    cat = jnp.concatenate(priors, axis=-1)
    out = jax.lax.conv_general_dilated(
        cat, params['wb'], window_strides=(1, 1), padding='SAME',
        dimension_numbers=('NHWC', 'HWIO', 'NHWC'))
    out = out * params['b_scale'].reshape(1, 1, 1, -1) + params['b_bias'].reshape(1, 1, 1, -1)
    out = jnp.where(out >= 0, out, LEAKY_SLOPE * out)
    return jnp.transpose(out, (0, 3, 1, 2))


if __name__ == "__main__":
    key = jax.random.PRNGKey(0)
    k_x, k_p = jax.random.split(key)

    # small shapes consistent with the module's forward
    N, Cin, H, W = 2, 4, 16, 16
    Cout = 8
    sizes = (1, 2, 3, 6)

    feats = jax.random.normal(k_x, (N, Cin, H, W), jnp.float32)
    params = init_params(k_p, Cin, Cout, sizes)

    out = psp_forward(feats, params, sizes)
    out = jax.block_until_ready(out)

    ref = psp_reference(feats, params, sizes)
    assert out.shape == (N, Cout, H, W), out.shape
    np.testing.assert_allclose(np.asarray(out), np.asarray(ref), atol=2e-4, rtol=2e-4)

    print("KERNEL_OK")
</pallas_src>

<mosaic_0001>
module attributes {stable_mosaic.version = 11 : i64} {
  func.func @_fused_stage_kernel(%arg0: i32, %arg1: memref<1x256x4xf32, #tpu.memory_space<vmem>>, %arg2: memref<50x256xf32, #tpu.memory_space<vmem>>, %arg3: memref<4x32xf32, #tpu.memory_space<vmem>>, %arg4: memref<1x32xf32, #tpu.memory_space<vmem>>, %arg5: memref<1x32xf32, #tpu.memory_space<vmem>>, %arg6: memref<50x32xf32, #tpu.memory_space<vmem>>, %arg7: memref<256x50xf32, #tpu.memory_space<vmem>>, %arg8: memref<1x256x36xf32, #tpu.memory_space<vmem>>) attributes {dimension_semantics = [#tpu.dimension_semantics<parallel>], iteration_bounds = array<i64: 2>, scalar_prefetch = 0 : i64, scratch_operands = 0 : i64, tpu.core_type = #tpu.core_type<tc>, window_params = [{transform_indices = @transform_0, window_bounds = array<i64: 1, 256, 4>}, {pipeline_mode = #tpu.pipeline_mode<synchronous>, transform_indices = @transform_1, window_bounds = array<i64: 50, 256>}, {pipeline_mode = #tpu.pipeline_mode<synchronous>, transform_indices = @transform_2, window_bounds = array<i64: 4, 32>}, {pipeline_mode = #tpu.pipeline_mode<synchronous>, transform_indices = @transform_3, window_bounds = array<i64: 1, 32>}, {pipeline_mode = #tpu.pipeline_mode<synchronous>, transform_indices = @transform_4, window_bounds = array<i64: 1, 32>}, {pipeline_mode = #tpu.pipeline_mode<synchronous>, transform_indices = @transform_5, window_bounds = array<i64: 50, 32>}, {pipeline_mode = #tpu.pipeline_mode<synchronous>, transform_indices = @transform_6, window_bounds = array<i64: 256, 50>}, {transform_indices = @transform_7, window_bounds = array<i64: 1, 256, 36>}]} {
    %c0 = arith.constant 0 : index
    %c0_0 = arith.constant 0 : index
    %c0_1 = arith.constant 0 : index
    %0 = vector.load %arg1[%c0, %c0_0, %c0_1] : memref<1x256x4xf32, #tpu.memory_space<vmem>>, vector<1x256x4xf32>
    %1 = vector.shape_cast %0 : vector<1x256x4xf32> to vector<256x4xf32>
    %c0_2 = arith.constant 0 : index
    %c0_3 = arith.constant 0 : index
    %2 = vector.load %arg2[%c0_2, %c0_3] : memref<50x256xf32, #tpu.memory_space<vmem>>, vector<50x256xf32>
    %cst = arith.constant dense<0.000000e+00> : vector<50x4xf32>
    %3 = tpu.matmul %2, %1, %cst {dimension_numbers = #tpu.dot_dimension_numbers<[1], [0], [0], [1], [0, 0, 1, 1], [], []>} : vector<50x256xf32>, vector<256x4xf32>, vector<50x4xf32> -> vector<50x4xf32>
    %c0_4 = arith.constant 0 : index
    %c0_5 = arith.constant 0 : index
    %4 = vector.load %arg3[%c0_4, %c0_5] : memref<4x32xf32, #tpu.memory_space<vmem>>, vector<4x32xf32>
    %cst_6 = arith.constant dense<0.000000e+00> : vector<50x32xf32>
    %5 = tpu.matmul %3, %4, %cst_6 {dimension_numbers = #tpu.dot_dimension_numbers<[1], [0], [0], [1], [0, 0, 1, 1], [], []>} : vector<50x4xf32>, vector<4x32xf32>, vector<50x32xf32> -> vector<50x32xf32>
    %c0_7 = arith.constant 0 : index
    %c0_8 = arith.constant 0 : index
    %6 = vector.load %arg4[%c0_7, %c0_8] : memref<1x32xf32, #tpu.memory_space<vmem>>, vector<1x32xf32>
    %7 = vector.broadcast %6 : vector<1x32xf32> to vector<50x32xf32>
    %8 = arith.mulf %5, %7 : vector<50x32xf32>
    %c0_9 = arith.constant 0 : index
    %c0_10 = arith.constant 0 : index
    %9 = vector.load %arg5[%c0_9, %c0_10] : memref<1x32xf32, #tpu.memory_space<vmem>>, vector<1x32xf32>
    %10 = vector.broadcast %9 : vector<1x32xf32> to vector<50x32xf32>
    %11 = arith.addf %8, %10 : vector<50x32xf32>
    %cst_11 = arith.constant 0.000000e+00 : f32
    %12 = vector.broadcast %cst_11 : f32 to vector<50x32xf32>
    %13 = arith.cmpf oge, %11, %12 : vector<50x32xf32>
    %cst_12 = arith.constant 0.00999999977 : f32
    %14 = vector.broadcast %cst_12 : f32 to vector<50x32xf32>
    %15 = arith.mulf %14, %11 : vector<50x32xf32>
    %16 = arith.select %13, %11, %15 : vector<50x32xi1>, vector<50x32xf32>
    %c0_13 = arith.constant 0 : index
    %c0_14 = arith.constant 0 : index
    %17 = vector.load %arg6[%c0_13, %c0_14] : memref<50x32xf32, #tpu.memory_space<vmem>>, vector<50x32xf32>
    %18 = arith.mulf %16, %17 : vector<50x32xf32>
    %c0_15 = arith.constant 0 : index
    %c0_16 = arith.constant 0 : index
    %19 = vector.load %arg7[%c0_15, %c0_16] : memref<256x50xf32, #tpu.memory_space<vmem>>, vector<256x50xf32>
    %cst_17 = arith.constant dense<0.000000e+00> : vector<256x32xf32>
    %20 = tpu.matmul %19, %18, %cst_17 {dimension_numbers = #tpu.dot_dimension_numbers<[1], [0], [0], [1], [0, 0, 1, 1], [], []>} : vector<256x50xf32>, vector<50x32xf32>, vector<256x32xf32> -> vector<256x32xf32>
    %21 = tpu.concatenate %20, %1 in 1 : vector<256x32xf32>, vector<256x4xf32> -> vector<256x36xf32>
    %c0_18 = arith.constant 0 : index
    %c0_19 = arith.constant 0 : index
    %c0_20 = arith.constant 0 : index
    %22 = vector.load %arg8[%c0_18, %c0_19, %c0_20] : memref<1x256x36xf32, #tpu.memory_space<vmem>>, vector<1x256x36xf32>
    %23 = vector.shape_cast %22 : vector<1x256x36xf32> to vector<256x36xf32>
    %24 = vector.shape_cast %21 : vector<256x36xf32> to vector<1x256x36xf32>
    tpu.vector_store %arg8[%c0_18, %c0_19, %c0_20], %24 {strides = array<i32>} : memref<1x256x36xf32, #tpu.memory_space<vmem>>, vector<1x256x36xf32>,
    return
  }
  func.func @transform_0(%arg0: i32) -> (i32, i32, i32) {
    %c0_i32 = arith.constant 0 : i32
    %c0_i32_0 = arith.constant 0 : i32
    %c0_i32_1 = arith.constant 0 : i32
    return %arg0, %c0_i32, %c0_i32_0 : i32, i32, i32
  }
  func.func @transform_1(%arg0: i32) -> (i32, i32) {
    %c0_i32 = arith.constant 0 : i32
    %c0_i32_0 = arith.constant 0 : i32
    %c0_i32_1 = arith.constant 0 : i32
    return %c0_i32, %c0_i32_0 : i32, i32
  }
  func.func @transform_2(%arg0: i32) -> (i32, i32) {
    %c0_i32 = arith.constant 0 : i32
    %c0_i32_0 = arith.constant 0 : i32
    %c0_i32_1 = arith.constant 0 : i32
    return %c0_i32, %c0_i32_0 : i32, i32
  }
  func.func @transform_3(%arg0: i32) -> (i32, i32) {
    %c0_i32 = arith.constant 0 : i32
    %c0_i32_0 = arith.constant 0 : i32
    %c0_i32_1 = arith.constant 0 : i32
    return %c0_i32, %c0_i32_0 : i32, i32
  }
  func.func @transform_4(%arg0: i32) -> (i32, i32) {
    %c0_i32 = arith.constant 0 : i32
    %c0_i32_0 = arith.constant 0 : i32
    %c0_i32_1 = arith.constant 0 : i32
    return %c0_i32, %c0_i32_0 : i32, i32
  }
  func.func @transform_5(%arg0: i32) -> (i32, i32) {
    %c0_i32 = arith.constant 0 : i32
    %c0_i32_0 = arith.constant 0 : i32
    %c0_i32_1 = arith.constant 0 : i32
    return %c0_i32, %c0_i32_0 : i32, i32
  }
  func.func @transform_6(%arg0: i32) -> (i32, i32) {
    %c0_i32 = arith.constant 0 : i32
    %c0_i32_0 = arith.constant 0 : i32
    %c0_i32_1 = arith.constant 0 : i32
    return %c0_i32, %c0_i32_0 : i32, i32
  }
  func.func @transform_7(%arg0: i32) -> (i32, i32, i32) {
    %c0_i32 = arith.constant 0 : i32
    %c0_i32_0 = arith.constant 0 : i32
    %c0_i32_1 = arith.constant 0 : i32
    return %arg0, %c0_i32, %c0_i32_0 : i32, i32, i32
  }
}

</mosaic_0001>

<bundles_post_ra>
// kernel: tpu_custom_call.1
= control target key start
LH: loop header
LB: loop body
LE: loop exit
PB: predicated region body
PF: predicated region fallthrough
CT: control target
= control target key end

     0   :  { %s1539_s24 = smov 0   ;;  %s2076_s0 = inlined_call_operand.vmem [shape: f32[2,256,4], index: 0, kind: input, shape index: {}]   ;;  %s2077_s1 = inlined_call_operand.vmem [shape: f32[50,256], index: 1, kind: input, shape index: {}]   ;;  %s2078_s2 = inlined_call_operand.vmem [shape: f32[4,32], index: 2, kind: input, shape index: {}]   ;;  %s2079_s3 = inlined_call_operand.vmem [shape: f32[1,32], index: 3, kind: input, shape index: {}]   ;;  %s2080_s4 = inlined_call_operand.vmem [shape: f32[1,32], index: 4, kind: input, shape index: {}]   ;;  %s2081_s5 = inlined_call_operand.vmem [shape: f32[50,32], index: 5, kind: input, shape index: {}]   ;;  %s2082_s6 = inlined_call_operand.vmem [shape: f32[256,50], index: 6, kind: input, shape index: {}]   ;;  %s2083_s7 = inlined_call_operand.vmem [shape: f32[2,256,36], index: 7, kind: output, shape index: {}]  }
   0x1 LB: > { %s1222_s25 = sadd.s32 4294967295, %s1494_s24   ;;  %p1226_p0 = scmp.ge.s32.totalorder %s1494_s24, 1  ;;  %s1494_s24 = sphi %s1539_s24, %s17_s24  }
   0x2   : > { %p237_p1 = scmp.lt.s32.totalorder %s1494_s24, 3 }
   0x4   : > { %p238_p2 = pnand %p1226_p0, %p237_p1 }
   0x5   : > { %p269_p3 = scmp.lt.s32.totalorder (!%p238_p2), %s1222_s25, 1  ;;  %s1498_s21 = smov (!%p238_p2), 32  }
   0x6   : > { %241 = sbr.rel (%p238_p2) target bundleno = 725 (0x2d5), region = 48 }
   0xb   : > { %v312_v0 = vld [vmem:[%s2077_s1 + $0x8] sm:$0xff]  ;;  %s2085_s25 = smov (!%p269_p3, %s1222_s25), 1  ;;  %v311_v33 = vld [vmem:[%s2077_s1] sm:$0xff]  ;;  %v314_v34 = vld [vmem:[%s2077_s1 + $0x18] sm:$0xff]  ;;  %v1496_v46 = vmov 0.0   ;;  %vm448_vm0 = vcmask 1043456  }
   0xc   : > { %389 = vmatprep.mubr.f32.mxu0 %v312_v0  ;;  %s1276_s28 = sshll.u32 %s2085_s25, 8  ;;  %v313_v35 = vld [vmem:[%s2077_s1 + $0x10] sm:$0xff]  ;;  %v316_v36 = vld [vmem:[%s2077_s1 + $0x28] sm:$0xff]  ;;  %v315_v37 = vld [vmem:[%s2077_s1 + $0x20] sm:$0xff]  ;;  %1378 = vmatprep.subr.mxu1 %v1496_v46  ;;  %vm1497_vm1 = vmmov 0   ;;  %vm426_vm2 = vcmask 31744  }
   0xd   : > { %s1558_s8 = scalar_lea.vmem %s2076_s0, %s1276_s28  ;;  %v318_v38 = vld [vmem:[%s2077_s1 + $0x38] sm:$0xff]  ;;  %v317_v39 = vld [vmem:[%s2077_s1 + $0x30] sm:$0xff]  ;;  %v320_v40 = vld [vmem:[%s2077_s1 + $0x48] sm:$0xff]  ;;  %1380 = vmatprep.mubr.msk.f32.mxu1 %vm1497_vm1, %v1496_v46  ;;  %vm647_vm3 = vcmask 408576   ;;  %vm744_vm7 = vcmask 1041408   ;;  %vm1101_vm12 = vcmask 261120   ;;  %s1974_s22 = scalar_lea.vmem %s2083_s7, %s1276_s28 }
   0xe   : > { %v1561_v1 = vld [vmem:[%s1558_s8 + $0xf8] sm:$0xff]  ;;  %v1567_v3 = vld [vmem:[%s1558_s8 + $0xf0] sm:$0xff]  ;;  %v1575_v5 = vld [vmem:[%s1558_s8 + $0xe8] sm:$0xff]  ;;  %vm1134_vm13 = vcmask 293888  }
   0xf   : > { %v1564_v2 = vld [vmem:[%s1558_s8 + $0x78] sm:$0xff]  ;;  %1278 = vmatprep.subr.mxu0 %v1561_v1  ;;  %v1571_v4 = vld [vmem:[%s1558_s8 + $0x70] sm:$0xff]  ;;  %v1579_v6 = vld [vmem:[%s1558_s8 + $0x68] sm:$0xff] }
  0x10   : > { %1279 = vmatpush3.msra.mxu0 %v1564_v2  ;;  %v1583_v7 = vld [vmem:[%s1558_s8 + $0xe0] sm:$0xff]  ;;  %v1591_v9 = vld [vmem:[%s1558_s8 + $0xd8] sm:$0xff]  ;;  %v1599_v11 = vld [vmem:[%s1558_s8 + $0xd0] sm:$0xff] }
  0x11   : > { %1280 = vmatprep.subr.mxu0 %v1567_v3  ;;  %v1587_v8 = vld [vmem:[%s1558_s8 + $0x60] sm:$0xff]  ;;  %v1595_v10 = vld [vmem:[%s1558_s8 + $0x58] sm:$0xff]  ;;  %v1603_v12 = vld [vmem:[%s1558_s8 + $0x50] sm:$0xff] }
  0x12   : > { %1281 = vmatpush3.msra.mxu0 %v1571_v4  ;;  %v1607_v13 = vld [vmem:[%s1558_s8 + $0xc8] sm:$0xff]  ;;  %v1615_v15 = vld [vmem:[%s1558_s8 + $0xc0] sm:$0xff]  ;;  %v1623_v17 = vld [vmem:[%s1558_s8 + $0xb8] sm:$0xff] }
  0x13   : > { %1282 = vmatprep.subr.mxu0 %v1575_v5  ;;  %v1611_v14 = vld [vmem:[%s1558_s8 + $0x48] sm:$0xff]  ;;  %v1619_v16 = vld [vmem:[%s1558_s8 + $0x40] sm:$0xff]  ;;  %v1627_v18 = vld [vmem:[%s1558_s8 + $0x38] sm:$0xff] }
  0x14   : > { %1283 = vmatpush3.msra.mxu0 %v1579_v6  ;;  %v1631_v19 = vld [vmem:[%s1558_s8 + $0xb0] sm:$0xff]  ;;  %v1639_v21 = vld [vmem:[%s1558_s8 + $0xa8] sm:$0xff]  ;;  %v1647_v23 = vld [vmem:[%s1558_s8 + $0xa0] sm:$0xff] }
  0x15   : > { %1284 = vmatprep.subr.mxu0 %v1583_v7  ;;  %v1635_v20 = vld [vmem:[%s1558_s8 + $0x30] sm:$0xff]  ;;  %v1643_v22 = vld [vmem:[%s1558_s8 + $0x28] sm:$0xff]  ;;  %v1651_v24 = vld [vmem:[%s1558_s8 + $0x20] sm:$0xff] }
  0x16   : > { %1285 = vmatpush3.msra.mxu0 %v1587_v8  ;;  %v1655_v25 = vld [vmem:[%s1558_s8 + $0x98] sm:$0xff]  ;;  %v1663_v27 = vld [vmem:[%s1558_s8 + $0x90] sm:$0xff]  ;;  %v1671_v29 = vld [vmem:[%s1558_s8 + $0x88] sm:$0xff] }
  0x17   : > { %1286 = vmatprep.subr.mxu0 %v1591_v9  ;;  %v1659_v26 = vld [vmem:[%s1558_s8 + $0x18] sm:$0xff]  ;;  %v1667_v28 = vld [vmem:[%s1558_s8 + $0x10] sm:$0xff]  ;;  %v1675_v30 = vld [vmem:[%s1558_s8 + $0x8] sm:$0xff] }
  0x18   : > { %1287 = vmatpush3.msra.mxu0 %v1595_v10  ;;  %v1679_v31 = vld [vmem:[%s1558_s8 + $0x80] sm:$0xff]  ;;  %v322_v42 = vld [vmem:[%s2077_s1 + $0x58] sm:$0xff]  ;;  %v321_v43 = vld [vmem:[%s2077_s1 + $0x50] sm:$0xff]  ;;  %1009 = vrot.lane.b32.xlu1 %v1667_v28, %s1498_s21 }
  0x19   : > { %1288 = vmatprep.subr.mxu0 %v1599_v11  ;;  %v1683_v32 = vld [vmem:[%s1558_s8] sm:$0xff]  ;;  %v324_v44 = vld [vmem:[%s2077_s1 + $0x68] sm:$0x3] }
  0x1a   : > { %1289 = vmatpush3.msra.mxu0 %v1603_v12  ;;  %v319_v41 = vld [vmem:[%s2077_s1 + $0x40] sm:$0xff]  ;;  %1005 = vrot.lane.b32.xlu0 %v1683_v32, %s1498_s21 }
  0x1b   : > { %1290 = vmatprep.subr.mxu0 %v1607_v13  ;;  %v323_v45 = vld [vmem:[%s2077_s1 + $0x60] sm:$0x3] }
  0x1c   : > { %1291 = vmatpush3.msra.mxu0 %v1611_v14  ;;  %v425_v47 = vld [vmem:[%s2078_s2] sm:$0xf]  ;;  %1011 = vrot.lane.b32.xlu1 %v1659_v26, %s1498_s21 }
  0x1d   : > { %1292 = vmatprep.subr.mxu0 %v1615_v15  ;;  %1379 = vmatpush3.msk.msra.mxu1 %vm448_vm0, %v425_v47 }
  0x1e   : > { %1293 = vmatpush3.msra.mxu0 %v1619_v16  ;;  %1007 = vrot.lane.b32.xlu0 %v1675_v30, %s1498_s21 }
  0x1f   : > { %1294 = vmatprep.subr.mxu0 %v1623_v17 }
  0x20   : > { %1295 = vmatpush3.msra.mxu0 %v1627_v18  ;;  %1015 = vrot.lane.b32.xlu1 %v1643_v22, %s1498_s21 }
  0x21   : > { %1296 = vmatprep.subr.mxu0 %v1631_v19 }
  0x22   : > { %1297 = vmatpush3.msra.mxu0 %v1635_v20  ;;  %1013 = vrot.lane.b32.xlu0 %v1651_v24, %s1498_s21 }
  0x23   : > { %1298 = vmatprep.subr.mxu0 %v1639_v21 }
  0x24   : > { %1299 = vmatpush3.msra.mxu0 %v1643_v22  ;;  %1019 = vrot.lane.b32.xlu1 %v1627_v18, %s1498_s21 }
  0x25   : > { %1300 = vmatprep.subr.mxu0 %v1647_v23 }
  0x26   : > { %1301 = vmatpush3.msra.mxu0 %v1651_v24  ;;  %1017 = vrot.lane.b32.xlu0 %v1635_v20, %s1498_s21 }
  0x27   : > { %1302 = vmatprep.subr.mxu0 %v1655_v25 }
  0x28   : > { %1303 = vmatpush3.msra.mxu0 %v1659_v26  ;;  %1023 = vrot.lane.b32.xlu1 %v1611_v14, %s1498_s21 }
  0x29   : > { %1304 = vmatprep.subr.mxu0 %v1663_v27 }
  0x2a   : > { %1305 = vmatpush3.msra.mxu0 %v1667_v28  ;;  %1021 = vrot.lane.b32.xlu0 %v1619_v16, %s1498_s21 }
  0x2b   : > { %1306 = vmatprep.subr.mxu0 %v1671_v29 }
  0x2c   : > { %1307 = vmatpush3.msra.mxu0 %v1675_v30  ;;  %1027 = vrot.lane.b32.xlu1 %v1595_v10, %s1498_s21 }
  0x2d   : > { %1308 = vmatprep.subr.mxu0 %v1679_v31 }
  0x2e   : > { %1309 = vmatpush3.msra.mxu0 %v1683_v32  ;;  %1025 = vrot.lane.b32.xlu0 %v1603_v12, %s1498_s21 }
  0x2f   : > { %390 = vmatmul.mubr.f32.vlgmr.msra.gmra.mxu0 %v311_v33 }
  0x30   : > { %394 = vmatprep.mubr.f32.mxu0 %v314_v34  ;;  %1031 = vrot.lane.b32.xlu1 %v1579_v6, %s1498_s21 }
  0x32   : > { %1029 = vrot.lane.b32.xlu0 %v1587_v8, %s1498_s21 }
  0x33   : > { %395 = vmatmul.mubr.f32.gmra.mxu0 %v313_v35 }
  0x34   : > { %399 = vmatprep.mubr.f32.mxu0 %v316_v36  ;;  %1035 = vrot.lane.b32.xlu1 %v1564_v2, %s1498_s21 }
  0x36   : > { %1033 = vrot.lane.b32.xlu0 %v1571_v4, %s1498_s21 }
  0x37   : > { %400 = vmatmul.mubr.f32.gmra.mxu0 %v315_v37  ;;  %v615_v37 = vld [vmem:[%s2082_s6] sm:$0xff] }
  0x38   : > { %404 = vmatprep.mubr.f32.mxu0 %v318_v38  ;;  %v623_v38 = vld [vmem:[%s2082_s6 + $0x40] sm:$0xff]  ;;  %1039 = vrot.lane.b32.xlu1 %v1671_v29, %s1498_s21 }
  0x3a   : > { %1037 = vrot.lane.b32.xlu0 %v1679_v31, %s1498_s21  ;;  %v607_v31 = vld [vmem:[%s2081_s5 + $0x30] sm:$0x3] }
  0x3b   : > { %405 = vmatmul.mubr.f32.gmra.mxu0 %v317_v39 }
  0x3c   : > { %409 = vmatprep.mubr.f32.mxu0 %v320_v40  ;;  %1043 = vrot.lane.b32.xlu1 %v1655_v25, %s1498_s21 }
  0x3e   : > { %1041 = vrot.lane.b32.xlu0 %v1663_v27, %s1498_s21 }
  0x3f   : > { %410 = vmatmul.mubr.f32.gmra.mxu0 %v319_v41 }
  0x40   : > { %414 = vmatprep.mubr.f32.mxu0 %v322_v42  ;;  %1047 = vrot.lane.b32.xlu1 %v1639_v21, %s1498_s21 }
  0x42   : > { %1045 = vrot.lane.b32.xlu0 %v1647_v23, %s1498_s21 }
  0x43   : > { %415 = vmatmul.mubr.f32.gmra.mxu0 %v321_v43  ;;  %v606_v43 = vld [vmem:[%s2081_s5 + $0x28] sm:$0xff] }
  0x44   : > { %419 = vmatprep.mubr.f32.mxu0 %v324_v44  ;;  %1051 = vrot.lane.b32.xlu1 %v1623_v17, %s1498_s21 }
  0x46   : > { %1049 = vrot.lane.b32.xlu0 %v1631_v19, %s1498_s21  ;;  %v1239_v19 = vld [vmem:[%s2079_s3] ss:$0 sm:$0xff] }
  0x47   : > { %420 = vmatmul.mubr.f32.gmra.mxu0 %v323_v45 }
  0x48   : > { %1415 = vmatprep.mubr.msk.f32.mxu0 %vm647_vm3, %v615_v37  ;;  %1055 = vrot.lane.b32.xlu1 %v1607_v13, %s1498_s21  ;;  %v618_v37 = vld [vmem:[%s2082_s6 + $0x18] sm:$0xff] }
  0x4a   : > { %1053 = vrot.lane.b32.xlu0 %v1615_v15, %s1498_s21 }
  0x4c   : > { %1059 = vrot.lane.b32.xlu1 %v1591_v9, %s1498_s21  ;;  %v1240_v9 = vld [vmem:[%s2080_s4] ss:$0 sm:$0xff] }
  0x4e   : > { %1057 = vrot.lane.b32.xlu0 %v1599_v11, %s1498_s21 }
  0x50   : > { %1063 = vrot.lane.b32.xlu1 %v1575_v5, %s1498_s21 }
  0x52   : > { %1061 = vrot.lane.b32.xlu0 %v1583_v7, %s1498_s21 }
  0x54   : > { %1067 = vrot.lane.b32.xlu1 %v1561_v1, %s1498_s21 }
  0x56   : > { %1065 = vrot.lane.b32.xlu0 %v1567_v3, %s1498_s21 }
  0xef   : > { %v1310_v48 = vpop.f32.mrf.mxu0 }
  0xf1   : > { %v1311_v49 = vpop.f32.mrf.mxu0 }
  0xf2   : > { %v1312_v50 = vadd.f32 %v1311_v49, %v1310_v48  ;;  %v605_v48 = vld [vmem:[%s2081_s5 + $0x20] sm:$0xff] }
  0xf3   : > { %v1313_v51 = vpop.f32.mrf.mxu0 }
  0xf4   : > { %1381 = vmatmul.mubr.msk.f32.vlgmr.msra.gmra.mxu1 %vm426_vm2, %v1312_v50 }
  0xf5   : > { %v1314_v52 = vpop.f32.mrf.mxu0  ;;  %1383 = vmatprep.mubr.msk.f32.mxu1 %vm1497_vm1, %v1496_v46 }
  0xf6   : > { %v1315_v53 = vadd.f32 %v1314_v52, %v1313_v51  ;;  %v604_v52 = vld [vmem:[%s2081_s5 + $0x18] sm:$0xff] }
  0xf7   : > { %v1316_v54 = vpop.f32.mrf.mxu0 }
  0xf8   : > { %1384 = vmatmul.mubr.msk.f32.gmra.mxu1 %vm426_vm2, %v1315_v53 }
  0xf9   : > { %v1317_v55 = vpop.f32.mrf.mxu0  ;;  %1386 = vmatprep.mubr.msk.f32.mxu1 %vm1497_vm1, %v1496_v46 }
  0xfa   : > { %v1318_v56 = vadd.f32 %v1317_v55, %v1316_v54 }
  0xfb   : > { %v1319_v57 = vpop.f32.mrf.mxu0 }
  0xfc   : > { %1387 = vmatmul.mubr.msk.f32.gmra.mxu1 %vm426_vm2, %v1318_v56  ;;  %v603_v56 = vld [vmem:[%s2081_s5 + $0x10] sm:$0xff] }
  0xfd   : > { %v1320_v58 = vpop.f32.mrf.mxu0  ;;  %1389 = vmatprep.mubr.msk.f32.mxu1 %vm1497_vm1, %v1496_v46 }
  0xfe   : > { %v1321_v59 = vadd.f32 %v1320_v58, %v1319_v57 }
  0xff   : > { %v1322_v60 = vpop.f32.mrf.mxu0 }
 0x100   : > { %1390 = vmatmul.mubr.msk.f32.gmra.mxu1 %vm426_vm2, %v1321_v59  ;;  %v602_v59 = vld [vmem:[%s2081_s5 + $0x8] sm:$0xff] }
 0x101   : > { %v1323_v61 = vpop.f32.mrf.mxu0  ;;  %1392 = vmatprep.mubr.msk.f32.mxu1 %vm1497_vm1, %v1496_v46 }
 0x102   : > { %v1324_v62 = vadd.f32 %v1323_v61, %v1322_v60 }
 0x103   : > { %v1325_v63 = vpop.f32.mrf.mxu0 }
 0x104   : > { %1393 = vmatmul.mubr.msk.f32.gmra.mxu1 %vm426_vm2, %v1324_v62  ;;  %v601_v62 = vld [vmem:[%s2081_s5] sm:$0xff] }
 0x105   : > { %v1326_v0 = vpop.f32.mrf.mxu0  ;;  %1395 = vmatprep.mubr.msk.f32.mxu1 %vm1497_vm1, %v1496_v46 }
 0x106   : > { %v1327_v33 = vadd.f32 %v1326_v0, %v1325_v63 }
 0x107   : > { %v1328_v34 = vpop.f32.mrf.mxu0 }
 0x108   : > { %1396 = vmatmul.mubr.msk.f32.gmra.mxu1 %vm426_vm2, %v1327_v33  ;;  %v616_v33 = vld [vmem:[%s2082_s6 + $0x8] sm:$0xff] }
 0x109   : > { %v1329_v35 = vpop.f32.mrf.mxu0  ;;  %1398 = vmatprep.mubr.msk.f32.mxu1 %vm1497_vm1, %v1496_v46 }
 0x10a   : > { %v1330_v36 = vadd.f32 %v1329_v35, %v1328_v34  ;;  %v624_v34 = vld [vmem:[%s2082_s6 + $0x48] sm:$0xff]  ;;  %v617_v35 = vld [vmem:[%s2082_s6 + $0x10] sm:$0xff] }
 0x10c   : > { %1399 = vmatmul.mubr.msk.f32.gmra.mxu1 %vm426_vm2, %v1330_v36  ;;  %v625_v36 = vld [vmem:[%s2082_s6 + $0x50] sm:$0xff] }
 0x10d   : > { %1427 = vmatprep.mubr.msk.f32.mxu1 %vm647_vm3, %v623_v38  ;;  %v626_v38 = vld [vmem:[%s2082_s6 + $0x58] sm:$0xff] }
 0x1b4   : > { %v518_v10 = vpop.f32.mrf.mxu1 }
 0x1b5   : > { %v559_v30 = vmul.f32 %v1239_v19, %v518_v10  ;;  %v619_v10 = vld [vmem:[%s2082_s6 + $0x20] sm:$0xff] }
 0x1b6   : > { %v1382_v6 = vpop.f32.mrf.mxu1 }
 0x1b7   : > { %v573_v45 = vadd.f32 %v1240_v9, %v559_v30  ;;  %v627_v6 = vld [vmem:[%s2082_s6 + $0x60] sm:$0xff] }
 0x1b8   : > { %v523_v8 = vpop.f32.mrf.mxu1 }
 0x1b9   : > { %v560_v27 = vmul.f32 %v1239_v19, %v523_v8  ;;  %v587_v54 = vmul.f32 0.01, %v573_v45  ;;  %vm580_vm11 = vcmp.ge.f32.partialorder %v573_v45, 0.0  ;;  %v620_v8 = vld [vmem:[%s2082_s6 + $0x28] sm:$0xff] }
 0x1ba   : > { %v1385_v2 = vpop.f32.mrf.mxu1 }
 0x1bb   : > { %v574_v1 = vadd.f32 %v1240_v9, %v560_v27  ;;  %v594_v61 = vsel %vm580_vm11, %v573_v45, %v587_v54  ;;  %v628_v2 = vld [vmem:[%s2082_s6 + $0x68] sm:$0xff]  ;;  %v646_v27 = vld [vmem:[%s2082_s6 + $0xf8] sm:$0xff] }
 0x1bc   : > { %v528_v4 = vpop.f32.mrf.mxu1  ;;  %v608_v0 = vmul.f32 %v601_v62, %v594_v61 }
 0x1bd   : > { %v561_v24 = vmul.f32 %v1239_v19, %v528_v4  ;;  %v588_v50 = vmul.f32 0.01, %v574_v1  ;;  %vm581_vm10 = vcmp.ge.f32.partialorder %v574_v1, 0.0  ;;  %v621_v4 = vld [vmem:[%s2082_s6 + $0x30] sm:$0xff] }
 0x1be   : > { %v1388_v12 = vpop.f32.mrf.mxu1 }
 0x1bf   : > { %v575_v32 = vadd.f32 %v1240_v9, %v561_v24  ;;  %v595_v58 = vsel %vm581_vm10, %v574_v1, %v588_v50  ;;  %v629_v12 = vld [vmem:[%s2082_s6 + $0x70] sm:$0xff]  ;;  %v642_v24 = vld [vmem:[%s2082_s6 + $0xd8] sm:$0xff] }
 0x1c0   : > { %v533_v14 = vpop.f32.mrf.mxu1  ;;  %v609_v63 = vmul.f32 %v602_v59, %v595_v58 }
 0x1c1   : > { %v562_v11 = vmul.f32 %v1239_v19, %v533_v14  ;;  %v589_v46 = vmul.f32 0.01, %v575_v32  ;;  %vm582_vm9 = vcmp.ge.f32.partialorder %v575_v32, 0.0  ;;  %v622_v14 = vld [vmem:[%s2082_s6 + $0x38] sm:$0xff] }
 0x1c2   : > { %v1391_v16 = vpop.f32.mrf.mxu1 }
 0x1c3   : > { %v576_v7 = vadd.f32 %v1240_v9, %v562_v11  ;;  %v596_v55 = vsel %vm582_vm9, %v575_v32, %v589_v46  ;;  %v630_v16 = vld [vmem:[%s2082_s6 + $0x78] sm:$0xff]  ;;  %v639_v11 = vld [vmem:[%s2082_s6 + $0xc0] sm:$0xff] }
 0x1c4   : > { %v538_v18 = vpop.f32.mrf.mxu1  ;;  %v610_v60 = vmul.f32 %v603_v56, %v596_v55 }
 0x1c5   : > { %v563_v21 = vmul.f32 %v1239_v19, %v538_v18  ;;  %v590_v41 = vmul.f32 0.01, %v576_v7  ;;  %vm583_vm8 = vcmp.ge.f32.partialorder %v576_v7, 0.0  ;;  %v631_v18 = vld [vmem:[%s2082_s6 + $0x80] sm:$0xff] }
 0x1c6   : > { %v1394_v17 = vpop.f32.mrf.mxu1 }
 0x1c7   : > { %v577_v25 = vadd.f32 %v1240_v9, %v563_v21  ;;  %v597_v51 = vsel %vm583_vm8, %v576_v7, %v590_v41  ;;  %v632_v17 = vld [vmem:[%s2082_s6 + $0x88] sm:$0xff]  ;;  %v635_v21 = vld [vmem:[%s2082_s6 + $0xa0] sm:$0xff]  ;;  %v1010_v7 = vpop.permute.xlu1 %1009 }
 0x1c8   : > { %v543_v20 = vpop.f32.mrf.mxu1  ;;  %v611_v57 = vmul.f32 %v604_v52, %v597_v51 }
 0x1c9   : > { %v564_v22 = vmul.f32 %v1239_v19, %v543_v20  ;;  %v591_v39 = vmul.f32 0.01, %v577_v25  ;;  %vm584_vm6 = vcmp.ge.f32.partialorder %v577_v25, 0.0  ;;  %v634_v20 = vld [vmem:[%s2082_s6 + $0x98] sm:$0xff] }
 0x1ca   : > { %v1397_v13 = vpop.f32.mrf.mxu1 }
 0x1cb   : > { %v578_v15 = vadd.f32 %v1240_v9, %v564_v22  ;;  %v598_v47 = vsel %vm584_vm6, %v577_v25, %v591_v39  ;;  %v636_v22 = vld [vmem:[%s2082_s6 + $0xa8] sm:$0xff]  ;;  %v638_v13 = vld [vmem:[%s2082_s6 + $0xb8] sm:$0xff]  ;;  %v643_v25 = vld [vmem:[%s2082_s6 + $0xe0] sm:$0xff] }
 0x1cc   : > { %v548_v23 = vpop.f32.mrf.mxu1  ;;  %v612_v53 = vmul.f32 %v605_v48, %v598_v47 }
 0x1cd   : > { %v565_v26 = vmul.f32 %v1239_v19, %v548_v23  ;;  %v592_v28 = vmul.f32 0.01, %v578_v15  ;;  %vm585_vm4 = vcmp.ge.f32.partialorder %v578_v15, 0.0  ;;  %v633_v19 = vld [vmem:[%s2082_s6 + $0x90] sm:$0xff] }
 0x1ce   : > { %v1400_v5 = vpop.f32.mrf.mxu1  ;;  %v641_v23 = vld [vmem:[%s2082_s6 + $0xd0] sm:$0xff] }
 0x1cf   : > { %v579_v29 = vadd.f32 %v1240_v9, %v565_v26  ;;  %v599_v3 = vsel %vm585_vm4, %v578_v15, %v592_v28  ;;  %v637_v9 = vld [vmem:[%s2082_s6 + $0xb0] sm:$0xff]  ;;  %v640_v15 = vld [vmem:[%s2082_s6 + $0xc8] sm:$0xff]  ;;  %v1006_v28 = vpop.permute.xlu0 %1005 }
 0x1d0   : > { %v613_v49 = vmul.f32 %v606_v43, %v599_v3  ;;  %v644_v26 = vld [vmem:[%s2082_s6 + $0xe8] sm:$0xff]  ;;  %v645_v5 = vld [vmem:[%s2082_s6 + $0xf0] sm:$0xff] }
 0x1d1   : > { %vm586_vm5 = vcmp.ge.f32.partialorder %v579_v29, 0.0  ;;  %v593_v40 = vmul.f32 0.01, %v579_v29 }
 0x1d3   : > { %v600_v42 = vsel %vm586_vm5, %v579_v29, %v593_v40  ;;  %v1012_v29 = vpop.permute.xlu1 %1011  ;;  %v1008_v30 = vpop.permute.xlu0 %1007 }
 0x1d4   : > { %v614_v44 = vmul.f32 %v607_v31, %v600_v42 }
 0x1d6   : > { %1401 = vmatprep.subr.msk.mxu0 %vm744_vm7, %v614_v44  ;;  %1463 = vmatprep.subr.msk.mxu1 %vm744_vm7, %v614_v44 }
 0x1d7   : > { %1402 = vmatpush3.msk.msra.mxu0 %vm744_vm7, %v614_v44  ;;  %1470 = vmatpush3.msk.msra.mxu1 %vm744_vm7, %v614_v44  ;;  %v1016_v31 = vpop.permute.xlu1 %1015  ;;  %v1014_v32 = vpop.permute.xlu0 %1013 }
 0x1d8   : > { %1403 = vmatprep.subr.mxu0 %v613_v49  ;;  %1464 = vmatprep.subr.mxu1 %v613_v49 }
 0x1d9   : > { %1404 = vmatpush3.msra.mxu0 %v613_v49  ;;  %1471 = vmatpush3.msra.mxu1 %v613_v49 }
 0x1da   : > { %1405 = vmatprep.subr.mxu0 %v612_v53  ;;  %1465 = vmatprep.subr.mxu1 %v612_v53 }
 0x1db   : > { %1406 = vmatpush3.msra.mxu0 %v612_v53  ;;  %1472 = vmatpush3.msra.mxu1 %v612_v53  ;;  %v1020_v39 = vpop.permute.xlu1 %1019  ;;  %v1967_v40 = vpop.permute.xlu0 %1017 }
 0x1dc   : > { %1407 = vmatprep.subr.mxu0 %v611_v57  ;;  %1466 = vmatprep.subr.mxu1 %v611_v57 }
 0x1dd   : > { %1408 = vmatpush3.msra.mxu0 %v611_v57  ;;  %1473 = vmatpush3.msra.mxu1 %v611_v57 }
 0x1de   : > { %1409 = vmatprep.subr.mxu0 %v610_v60  ;;  %1467 = vmatprep.subr.mxu1 %v610_v60 }
 0x1df   : > { %1410 = vmatpush3.msra.mxu0 %v610_v60  ;;  %1474 = vmatpush3.msra.mxu1 %v610_v60  ;;  %v1024_v1 = vpop.permute.xlu1 %1023  ;;  %v1022_v41 = vpop.permute.xlu0 %1021 }
 0x1e0   : > { %1411 = vmatprep.subr.mxu0 %v609_v63  ;;  %1468 = vmatprep.subr.mxu1 %v609_v63 }
 0x1e1   : > { %1412 = vmatpush3.msra.mxu0 %v609_v63  ;;  %1475 = vmatpush3.msra.mxu1 %v609_v63 }
 0x1e2   : > { %1413 = vmatprep.subr.mxu0 %v608_v0  ;;  %1469 = vmatprep.subr.mxu1 %v608_v0 }
 0x1e3   : > { %1414 = vmatpush3.msra.mxu0 %v608_v0  ;;  %1476 = vmatpush3.msra.mxu1 %v608_v0  ;;  %v1028_v3 = vpop.permute.xlu1 %1027  ;;  %v1026_v42 = vpop.permute.xlu0 %1025 }
 0x1e4   : > { %1416 = vmatmul.mubr.msk.f32.vlgmr.msra.gmra.mxu0 %vm647_vm3, %v616_v33  ;;  %1428 = vmatmul.mubr.msk.f32.vlgmr.msra.gmra.mxu1 %vm647_vm3, %v624_v34 }
 0x1e5   : > { %1418 = vmatprep.mubr.msk.f32.mxu0 %vm647_vm3, %v617_v35  ;;  %1430 = vmatprep.mubr.msk.f32.mxu1 %vm647_vm3, %v625_v36 }
 0x1e7   : > { %v1032_v43 = vpop.permute.xlu1 %1031  ;;  %v1030_v44 = vpop.permute.xlu0 %1029 }
 0x1e8   : > { %1419 = vmatmul.mubr.msk.f32.gmra.mxu0 %vm647_vm3, %v618_v37  ;;  %1431 = vmatmul.mubr.msk.f32.gmra.mxu1 %vm647_vm3, %v626_v38 }
 0x1e9   : > { %1421 = vmatprep.mubr.msk.f32.mxu0 %vm647_vm3, %v619_v10  ;;  %1433 = vmatprep.mubr.msk.f32.mxu1 %vm647_vm3, %v627_v6 }
 0x1eb   : > { %v1036_v45 = vpop.permute.xlu1 %1035  ;;  %v1034_v46 = vpop.permute.xlu0 %1033 }
 0x1ec   : > { %1422 = vmatmul.mubr.msk.f32.gmra.mxu0 %vm647_vm3, %v620_v8  ;;  %1434 = vmatmul.mubr.msk.f32.gmra.mxu1 %vm647_vm3, %v628_v2 }
 0x1ed   : > { %1424 = vmatprep.mubr.msk.f32.mxu0 %vm647_vm3, %v621_v4  ;;  %1436 = vmatprep.mubr.msk.f32.mxu1 %vm647_vm3, %v629_v12 }
 0x1ef   : > { %v1040_v47 = vpop.permute.xlu1 %1039  ;;  %v1038_v52 = vpop.permute.xlu0 %1037 }
 0x1f0   : > { %1425 = vmatmul.mubr.msk.f32.gmra.mxu0 %vm647_vm3, %v622_v14  ;;  %1437 = vmatmul.mubr.msk.f32.gmra.mxu1 %vm647_vm3, %v630_v16 }
 0x1f1   : > { %1439 = vmatprep.mubr.msk.f32.mxu1 %vm647_vm3, %v631_v18 }
 0x1f3   : > { %v1044_v61 = vpop.permute.xlu1 %1043  ;;  %v1042_v34 = vpop.permute.xlu0 %1041 }
 0x1f4   : > { %1440 = vmatmul.mubr.msk.f32.gmra.mxu1 %vm647_vm3, %v632_v17 }
 0x1f5   : > { %1442 = vmatprep.mubr.msk.f32.mxu1 %vm647_vm3, %v633_v19 }
 0x1f7   : > { %v1048_v4 = vpop.permute.xlu1 %1047  ;;  %v1046_v17 = vpop.permute.xlu0 %1045 }
 0x1f8   : > { %1443 = vmatmul.mubr.msk.f32.gmra.mxu1 %vm647_vm3, %v634_v20 }
 0x1f9   : > { %1445 = vmatprep.mubr.msk.f32.mxu1 %vm647_vm3, %v635_v21 }
 0x1fc   : > { %1446 = vmatmul.mubr.msk.f32.gmra.mxu1 %vm647_vm3, %v636_v22 }
 0x1fd   : > { %1448 = vmatprep.mubr.msk.f32.mxu1 %vm647_vm3, %v637_v9 }
 0x200   : > { %1449 = vmatmul.mubr.msk.f32.gmra.mxu1 %vm647_vm3, %v638_v13 }
 0x201   : > { %1451 = vmatprep.mubr.msk.f32.mxu1 %vm647_vm3, %v639_v11 }
 0x204   : > { %1452 = vmatmul.mubr.msk.f32.gmra.mxu1 %vm647_vm3, %v640_v15  ;;  %v1052_v15 = vpop.permute.xlu1 %1051 }
 0x205   : > { %1454 = vmatprep.mubr.msk.f32.mxu1 %vm647_vm3, %v641_v23 }
 0x208   : > { %1455 = vmatmul.mubr.msk.f32.gmra.mxu1 %vm647_vm3, %v642_v24 }
 0x209   : > { %1457 = vmatprep.mubr.msk.f32.mxu1 %vm647_vm3, %v643_v25  ;;  %v1050_v25 = vpop.permute.xlu0 %1049 }
 0x20c   : > { %1458 = vmatmul.mubr.msk.f32.gmra.mxu1 %vm647_vm3, %v644_v26 }
 0x20d   : > { %1460 = vmatprep.mubr.msk.f32.mxu1 %vm647_vm3, %v645_v5 }
 0x210   : > { %1461 = vmatmul.mubr.msk.f32.gmra.mxu1 %vm647_vm3, %v646_v27 }
 0x2a4   : > { %v1417_v48 = vpop.f32.mrf.mxu0  ;;  %v1429_v49 = vpop.f32.mrf.mxu1 }
 0x2a5   : > { %v1103_v50 = vsel %vm1101_vm12, %v1417_v48, %v1008_v30  ;;  %v1111_v51 = vsel %vm1101_vm12, %v1429_v49, %v1024_v1 }
 0x2a6   : > { %v814_v53 = vpop.f32.mrf.mxu0  ;;  %1136 = vst.msk [vmem:[%s1974_s22 + $0x8] sm:$0xff] %vm1134_vm13, %v1103_v50  ;;  %1144 = vst.msk [vmem:[%s1974_s22 + $0x48] sm:$0xff] %vm1134_vm13, %v1111_v51  ;;  %v854_v54 = vpop.f32.mrf.mxu1 }
 0x2a7   : > { %v1102_v55 = vsel %vm1101_vm12, %v814_v53, %v1006_v28  ;;  %v1110_v56 = vsel %vm1101_vm12, %v854_v54, %v1022_v41  ;;  %v1056_v28 = vpop.permute.xlu1 %1055 }
 0x2a8   : > { %1135 = vst.msk [vmem:[%s1974_s22] sm:$0xff] %vm1134_vm13, %v1102_v55  ;;  %v1420_v57 = vpop.f32.mrf.mxu0  ;;  %1143 = vst.msk [vmem:[%s1974_s22 + $0x40] sm:$0xff] %vm1134_vm13, %v1110_v56  ;;  %v1432_v58 = vpop.f32.mrf.mxu1 }
 0x2a9   : > { %v1105_v59 = vsel %vm1101_vm12, %v1420_v57, %v1012_v29  ;;  %v1113_v60 = vsel %vm1101_vm12, %v1432_v58, %v1028_v3 }
 0x2aa   : > { %1138 = vst.msk [vmem:[%s1974_s22 + $0x18] sm:$0xff] %vm1134_vm13, %v1105_v59  ;;  %v824_v62 = vpop.f32.mrf.mxu0  ;;  %1146 = vst.msk [vmem:[%s1974_s22 + $0x58] sm:$0xff] %vm1134_vm13, %v1113_v60  ;;  %v864_v63 = vpop.f32.mrf.mxu1 }
 0x2ab   : > { %v1104_v0 = vsel %vm1101_vm12, %v824_v62, %v1010_v7  ;;  %v1112_v33 = vsel %vm1101_vm12, %v864_v63, %v1026_v42  ;;  %v1060_v41 = vpop.permute.xlu1 %1059 }
 0x2ac   : > { %1137 = vst.msk [vmem:[%s1974_s22 + $0x10] sm:$0xff] %vm1134_vm13, %v1104_v0  ;;  %v1423_v35 = vpop.f32.mrf.mxu0  ;;  %1145 = vst.msk [vmem:[%s1974_s22 + $0x50] sm:$0xff] %vm1134_vm13, %v1112_v33  ;;  %v1435_v36 = vpop.f32.mrf.mxu1 }
 0x2ad   : > { %v1107_v37 = vsel %vm1101_vm12, %v1423_v35, %v1016_v31  ;;  %v1115_v38 = vsel %vm1101_vm12, %v1435_v36, %v1032_v43  ;;  %v1054_v31 = vpop.permute.xlu0 %1053 }
 0x2ae   : > { %1140 = vst.msk [vmem:[%s1974_s22 + $0x28] sm:$0xff] %vm1134_vm13, %v1107_v37  ;;  %v834_v10 = vpop.f32.mrf.mxu0  ;;  %1148 = vst.msk [vmem:[%s1974_s22 + $0x68] sm:$0xff] %vm1134_vm13, %v1115_v38  ;;  %v874_v6 = vpop.f32.mrf.mxu1 }
 0x2af   : > { %v1106_v8 = vsel %vm1101_vm12, %v834_v10, %v1014_v32  ;;  %v1114_v2 = vsel %vm1101_vm12, %v874_v6, %v1030_v44  ;;  %v1064_v48 = vpop.permute.xlu1 %1063 }
 0x2b0   : > { %1139 = vst.msk [vmem:[%s1974_s22 + $0x20] sm:$0xff] %vm1134_vm13, %v1106_v8  ;;  %v1426_v12 = vpop.f32.mrf.mxu0  ;;  %1147 = vst.msk [vmem:[%s1974_s22 + $0x60] sm:$0xff] %vm1134_vm13, %v1114_v2  ;;  %v1438_v14 = vpop.f32.mrf.mxu1 }
 0x2b1   : > { %v1109_v16 = vsel %vm1101_vm12, %v1426_v12, %v1020_v39  ;;  %v1117_v18 = vsel %vm1101_vm12, %v1438_v14, %v1036_v45  ;;  %v1058_v43 = vpop.permute.xlu0 %1057 }
 0x2b2   : > { %1142 = vst.msk [vmem:[%s1974_s22 + $0x38] sm:$0xff] %vm1134_vm13, %v1109_v16  ;;  %v844_v19 = vpop.f32.mrf.mxu0  ;;  %1150 = vst.msk [vmem:[%s1974_s22 + $0x78] sm:$0xff] %vm1134_vm13, %v1117_v18  ;;  %v884_v20 = vpop.f32.mrf.mxu1 }
 0x2b3   : > { %v1108_v21 = vsel %vm1101_vm12, %v844_v19, %v1967_v40  ;;  %v1116_v22 = vsel %vm1101_vm12, %v884_v20, %v1034_v46  ;;  %v1068_v56 = vpop.permute.xlu1 %1067 }
 0x2b4   : > { %1141 = vst.msk [vmem:[%s1974_s22 + $0x30] sm:$0xff] %vm1134_vm13, %v1108_v21  ;;  %1149 = vst.msk [vmem:[%s1974_s22 + $0x70] sm:$0xff] %vm1134_vm13, %v1116_v22  ;;  %v1441_v9 = vpop.f32.mrf.mxu1 }
 0x2b5   : > { %v1119_v13 = vsel %vm1101_vm12, %v1441_v9, %v1040_v47  ;;  %v1062_v51 = vpop.permute.xlu0 %1061 }
 0x2b6   : > { %1152 = vst.msk [vmem:[%s1974_s22 + $0x88] sm:$0xff] %vm1134_vm13, %v1119_v13  ;;  %v894_v11 = vpop.f32.mrf.mxu1 }
 0x2b7   : > { %v1118_v23 = vsel %vm1101_vm12, %v894_v11, %v1038_v52 }
 0x2b8   : > { %1151 = vst.msk [vmem:[%s1974_s22 + $0x80] sm:$0xff] %vm1134_vm13, %v1118_v23  ;;  %v1444_v24 = vpop.f32.mrf.mxu1 }
 0x2b9   : > { %v1121_v26 = vsel %vm1101_vm12, %v1444_v24, %v1044_v61  ;;  %v1066_v59 = vpop.permute.xlu0 %1065 }
 0x2ba   : > { %1154 = vst.msk [vmem:[%s1974_s22 + $0x98] sm:$0xff] %vm1134_vm13, %v1121_v26  ;;  %v904_v5 = vpop.f32.mrf.mxu1 }
 0x2bb   : > { %v1120_v27 = vsel %vm1101_vm12, %v904_v5, %v1042_v34 }
 0x2bc   : > { %1153 = vst.msk [vmem:[%s1974_s22 + $0x90] sm:$0xff] %vm1134_vm13, %v1120_v27  ;;  %v1447_v7 = vpop.f32.mrf.mxu1 }
 0x2bd   : > { %v1123_v29 = vsel %vm1101_vm12, %v1447_v7, %v1048_v4 }
 0x2be   : > { %1156 = vst.msk [vmem:[%s1974_s22 + $0xa8] sm:$0xff] %vm1134_vm13, %v1123_v29  ;;  %v914_v30 = vpop.f32.mrf.mxu1 }
 0x2bf   : > { %v1122_v32 = vsel %vm1101_vm12, %v914_v30, %v1046_v17 }
 0x2c0   : > { %1155 = vst.msk [vmem:[%s1974_s22 + $0xa0] sm:$0xff] %vm1134_vm13, %v1122_v32  ;;  %v1450_v39 = vpop.f32.mrf.mxu1 }
 0x2c1   : > { %v1125_v40 = vsel %vm1101_vm12, %v1450_v39, %v1052_v15 }
 0x2c2   : > { %1158 = vst.msk [vmem:[%s1974_s22 + $0xb8] sm:$0xff] %vm1134_vm13, %v1125_v40  ;;  %v924_v1 = vpop.f32.mrf.mxu1 }
 0x2c3   : > { %v1124_v3 = vsel %vm1101_vm12, %v924_v1, %v1050_v25 }
 0x2c4   : > { %1157 = vst.msk [vmem:[%s1974_s22 + $0xb0] sm:$0xff] %vm1134_vm13, %v1124_v3  ;;  %v1453_v42 = vpop.f32.mrf.mxu1 }
 0x2c5   : > { %v1127_v44 = vsel %vm1101_vm12, %v1453_v42, %v1056_v28 }
 0x2c6   : > { %1160 = vst.msk [vmem:[%s1974_s22 + $0xc8] sm:$0xff] %vm1134_vm13, %v1127_v44  ;;  %v934_v45 = vpop.f32.mrf.mxu1 }
 0x2c7   : > { %v1126_v46 = vsel %vm1101_vm12, %v934_v45, %v1054_v31 }
 0x2c8   : > { %1159 = vst.msk [vmem:[%s1974_s22 + $0xc0] sm:$0xff] %vm1134_vm13, %v1126_v46  ;;  %v1456_v47 = vpop.f32.mrf.mxu1 }
 0x2c9   : > { %v1129_v49 = vsel %vm1101_vm12, %v1456_v47, %v1060_v41 }
 0x2ca   : > { %1162 = vst.msk [vmem:[%s1974_s22 + $0xd8] sm:$0xff] %vm1134_vm13, %v1129_v49  ;;  %v944_v50 = vpop.f32.mrf.mxu1 }
 0x2cb   : > { %v1128_v52 = vsel %vm1101_vm12, %v944_v50, %v1058_v43 }
 0x2cc   : > { %1161 = vst.msk [vmem:[%s1974_s22 + $0xd0] sm:$0xff] %vm1134_vm13, %v1128_v52  ;;  %v1459_v53 = vpop.f32.mrf.mxu1 }
 0x2cd   : > { %v1131_v54 = vsel %vm1101_vm12, %v1459_v53, %v1064_v48 }
 0x2ce   : > { %1164 = vst.msk [vmem:[%s1974_s22 + $0xe8] sm:$0xff] %vm1134_vm13, %v1131_v54  ;;  %v954_v55 = vpop.f32.mrf.mxu1 }
 0x2cf   : > { %v1130_v57 = vsel %vm1101_vm12, %v954_v55, %v1062_v51 }
 0x2d0   : > { %1163 = vst.msk [vmem:[%s1974_s22 + $0xe0] sm:$0xff] %vm1134_vm13, %v1130_v57  ;;  %v1462_v58 = vpop.f32.mrf.mxu1 }
 0x2d1   : > { %v1133_v60 = vsel %vm1101_vm12, %v1462_v58, %v1068_v56 }
 0x2d2   : > { %1166 = vst.msk [vmem:[%s1974_s22 + $0xf8] sm:$0xff] %vm1134_vm13, %v1133_v60  ;;  %v964_v61 = vpop.f32.mrf.mxu1 }
 0x2d3   : > { %v1132_v62 = vsel %vm1101_vm12, %v964_v61, %v1066_v59 }
 0x2d4   : > { %1165 = vst.msk [vmem:[%s1974_s22 + $0xf0] sm:$0xff] %vm1134_vm13, %v1132_v62 }
 0x2d5 PF: > { %s17_s24 = sadd.s32 1, %s1494_s24  }
 0x2d6   : > { %p14_p4 = scmp.ge.s32.totalorder %s17_s24, 4  }
 0x2d8   :  { %16 = sbr.rel (!%p14_p4) target bundleno = 1 (0x1), region = 78 }

</bundles_post_ra>
